<compile_context>
chip_gen: v7x
topology: tpu7x:2x2x1
jax: 0.10.0
libtpu: 0.0.40
codegen_flags: <defaults>
</compile_context>

<pallas_src>
import math
import jax
import jax.numpy as jnp
from jax.experimental import pallas as pl
from jax.experimental.pallas import tpu as pltpu

_LANE = 128
_SUBLANE = 8


def _round_up(v, m):
    return (v + m - 1) // m * m


# ----------------------------------------------------------------------------
# Kernel: one (block_m, tk) x-tile @ (tk, Npad) weight slab per grid step,
# accumulated over the reduction axis (axis 1 of the grid); bias is folded
# into the accumulator init, result written once on the last reduction step.
# ----------------------------------------------------------------------------
def _mlp_kernel(x_ref, w_ref, b_ref, y_ref, acc_ref):
    @pl.when(pl.program_id(1) == 0)
    def _init():
        acc_ref[...] = jnp.broadcast_to(b_ref[...], acc_ref.shape)

    acc_ref[...] += jnp.dot(
        x_ref[...], w_ref[...], preferred_element_type=jnp.float32
    )

    @pl.when(pl.program_id(1) == pl.num_programs(1) - 1)
    def _finalize():
        y_ref[...] = acc_ref[...]


# ----------------------------------------------------------------------------
# Parameters: nn.Linear-style init, stored ONCE in kernel layout:
#   w_pad: (input_dim, Npad)  (pre-transposed + lane-dense zero pad)
#   b_pad: (1, Npad)
# ----------------------------------------------------------------------------
def init_params(key, input_dim, nb_output):
    k_w, k_b = jax.random.split(key)
    bound = 1.0 / math.sqrt(input_dim)
    n_pad = _round_up(nb_output, _LANE)
    w = jax.random.uniform(k_w, (input_dim, nb_output), jnp.float32, -bound, bound)
    b = jax.random.uniform(k_b, (1, nb_output), jnp.float32, -bound, bound)
    w_pad = jnp.zeros((input_dim, n_pad), jnp.float32).at[:, :nb_output].set(w)
    b_pad = jnp.zeros((1, n_pad), jnp.float32).at[:, :nb_output].set(b)
    return {
        "w_pad": w_pad,
        "b_pad": b_pad,
        "input_dim": input_dim,
        "nb_output": nb_output,
    }


def _pick_block_m(batch):
    """Sublane-aligned batch tile, capped for VMEM; prefer >=2 grid steps."""
    bm = 256
    while bm > _SUBLANE and (batch + bm - 1) // bm < 2:
        bm //= 2
    return max(_SUBLANE, min(bm, _round_up(batch, _SUBLANE)))


# ----------------------------------------------------------------------------
# Forward wrapper.
# ----------------------------------------------------------------------------
def mlp_forward(x, params):
    w_pad = params["w_pad"]                       # (D, Npad)
    b_pad = params["b_pad"]                       # (1, Npad)
    d_in, n_pad = w_pad.shape
    n_out = params["nb_output"]

    x = x.astype(jnp.float32)
    if x.ndim == 3:
        # Original layout (seq, batch, feat); permute+flatten is folded into
        # the kernel by making seq the reduction grid axis.
        seq, batch, feat = x.shape
        assert seq * feat == d_in, "input_dim mismatch for 3-D input"
        x3 = x                                    # (seq, B, feat)
        w3 = w_pad.reshape(seq, feat, n_pad)      # contiguous reshape
        tk, k_steps = feat, seq
    else:
        assert x.ndim == 2 and x.shape[1] == d_in, "input_dim mismatch"
        batch = x.shape[0]
        x3 = x[None, :, :]                        # (1, B, D)
        w3 = w_pad[None, :, :]                    # (1, D, Npad)
        tk, k_steps = d_in, 1

    block_m = _pick_block_m(batch)
    b_padded = _round_up(batch, block_m)
    if b_padded != batch:
        x3 = jnp.pad(x3, ((0, 0), (0, b_padded - batch), (0, 0)))
    grid_m = b_padded // block_m

    # VMEM budget: double-buffered x/w/b/out tiles + scratch + headroom.
    x_tile = block_m * tk * 4
    w_tile = tk * n_pad * 4
    b_tile = _SUBLANE * n_pad * 4
    y_tile = block_m * n_pad * 4
    need = 2 * (x_tile + w_tile + b_tile + y_tile) + y_tile + (4 << 20)
    vmem_limit = int(min(max(need, 32 << 20), 64 << 20))

    y_full = pl.pallas_call(
        _mlp_kernel,
        out_shape=jax.ShapeDtypeStruct((b_padded, n_pad), jnp.float32),
        grid=(grid_m, k_steps),
        in_specs=[
            # x tile: batch-tiled, stepping along the reduction (seq/K) axis.
            pl.BlockSpec((None, block_m, tk), lambda i, s: (s, i, 0)),
            # weight slab for this reduction step (constant over batch axis).
            pl.BlockSpec((None, tk, n_pad), lambda i, s: (s, 0, 0)),
            # bias, resident.
            pl.BlockSpec((1, n_pad), lambda i, s: (0, 0)),
        ],
        out_specs=pl.BlockSpec((block_m, n_pad), lambda i, s: (i, 0)),
        scratch_shapes=[pltpu.VMEM((block_m, n_pad), jnp.float32)],
        compiler_params=pltpu.CompilerParams(
            dimension_semantics=("parallel", "arbitrary"),
            vmem_limit_bytes=vmem_limit,
        ),
        cost_estimate=pl.CostEstimate(
            flops=2 * batch * d_in * n_out,
            transcendentals=0,
            bytes_accessed=4 * (batch * d_in + d_in * n_out + batch * n_out),
        ),
    )(x3, w3, b_pad)

    # Drop batch padding and lane padding.
    return y_full[:batch, :n_out]


# ----------------------------------------------------------------------------
# Pure-JAX reference mirroring the PyTorch forward.
# ----------------------------------------------------------------------------
def reference_forward(x, params):
    x = x.astype(jnp.float32)
    if x.ndim == 3:
        x = jnp.transpose(x, (1, 0, 2))
    x2 = x.reshape(x.shape[0], -1)
    n_out = params["nb_output"]
    return x2 @ params["w_pad"][:, :n_out] + params["b_pad"][:, :n_out]


if __name__ == "__main__":
    key = jax.random.PRNGKey(0)
    k_x3, k_x2, k_p = jax.random.split(key, 3)

    # 3-D path: x (seq, batch, feat) -> permute -> (batch, seq, feat)
    #           -> flatten -> (batch, seq*feat); so input_dim = seq * feat.
    seq, batch, feat = 8, 4, 16
    input_dim = seq * feat          # 128
    nb_output = 10

    params = init_params(k_p, input_dim, nb_output)

    # --- 3-D input path ---
    x3 = jax.random.normal(k_x3, (seq, batch, feat), jnp.float32)
    y3 = mlp_forward(x3, params)
    jax.block_until_ready(y3)
    y3_ref = reference_forward(x3, params)
    assert y3.shape == (batch, nb_output)
    assert jnp.allclose(y3, y3_ref, atol=1e-4, rtol=1e-4)

    # --- 2-D input path ---
    x2 = jax.random.normal(k_x2, (batch, input_dim), jnp.float32)
    y2 = mlp_forward(x2, params)
    jax.block_until_ready(y2)
    y2_ref = reference_forward(x2, params)
    assert y2.shape == (batch, nb_output)
    assert jnp.allclose(y2, y2_ref, atol=1e-4, rtol=1e-4)

    print("KERNEL_OK")
</pallas_src>

<mosaic_0001>
module attributes {stable_mosaic.version = 11 : i64} {
  func.func @_mlp_kernel(%arg0: i32, %arg1: i32, %arg2: memref<1x8x16xf32, #tpu.memory_space<vmem>>, %arg3: memref<1x16x128xf32, #tpu.memory_space<vmem>>, %arg4: memref<1x128xf32, #tpu.memory_space<vmem>>, %arg5: memref<8x128xf32, #tpu.memory_space<vmem>>, %arg6: memref<8x128xf32, #tpu.memory_space<vmem>>) attributes {dimension_semantics = [#tpu.dimension_semantics<parallel>, #tpu.dimension_semantics<arbitrary>], iteration_bounds = array<i64: 1, 8>, scalar_prefetch = 0 : i64, scratch_operands = 1 : i64, tpu.core_type = #tpu.core_type<tc>, window_params = [{transform_indices = @transform_0, window_bounds = array<i64: 1, 8, 16>}, {transform_indices = @transform_1, window_bounds = array<i64: 1, 16, 128>}, {pipeline_mode = #tpu.pipeline_mode<synchronous>, transform_indices = @transform_2, window_bounds = array<i64: 1, 128>}, {transform_indices = @transform_3, window_bounds = array<i64: 8, 128>}]} {
    %c0_i32 = arith.constant 0 : i32
    %0 = arith.cmpi eq, %arg1, %c0_i32 : i32
    %1 = arith.extui %0 : i1 to i32
    %c0_i32_0 = arith.constant 0 : i32
    %2 = arith.cmpi ne, %1, %c0_i32_0 : i32
    scf.if %2 {
      %c0_11 = arith.constant 0 : index
      %c0_12 = arith.constant 0 : index
      %14 = vector.load %arg4[%c0_11, %c0_12] : memref<1x128xf32, #tpu.memory_space<vmem>>, vector<1x128xf32>
      %15 = vector.shape_cast %14 : vector<1x128xf32> to vector<1x128xf32>
      %16 = vector.broadcast %15 : vector<1x128xf32> to vector<8x128xf32>
      %c0_13 = arith.constant 0 : index
      %c0_14 = arith.constant 0 : index
      %17 = vector.load %arg6[%c0_13, %c0_14] : memref<8x128xf32, #tpu.memory_space<vmem>>, vector<8x128xf32>
      tpu.vector_store %arg6[%c0_13, %c0_14], %16 {strides = array<i32>} : memref<8x128xf32, #tpu.memory_space<vmem>>, vector<8x128xf32>,
    } else {
    }
    %c0 = arith.constant 0 : index
    %c0_1 = arith.constant 0 : index
    %3 = vector.load %arg6[%c0, %c0_1] : memref<8x128xf32, #tpu.memory_space<vmem>>, vector<8x128xf32>
    %c0_2 = arith.constant 0 : index
    %c0_3 = arith.constant 0 : index
    %c0_4 = arith.constant 0 : index
    %4 = vector.load %arg2[%c0_2, %c0_3, %c0_4] : memref<1x8x16xf32, #tpu.memory_space<vmem>>, vector<1x8x16xf32>
    %5 = vector.shape_cast %4 : vector<1x8x16xf32> to vector<8x16xf32>
    %c0_5 = arith.constant 0 : index
    %c0_6 = arith.constant 0 : index
    %c0_7 = arith.constant 0 : index
    %6 = vector.load %arg3[%c0_5, %c0_6, %c0_7] : memref<1x16x128xf32, #tpu.memory_space<vmem>>, vector<1x16x128xf32>
    %7 = vector.shape_cast %6 : vector<1x16x128xf32> to vector<16x128xf32>
    %cst = arith.constant dense<0.000000e+00> : vector<8x128xf32>
    %8 = tpu.matmul %5, %7, %cst {dimension_numbers = #tpu.dot_dimension_numbers<[1], [0], [0], [1], [0, 0, 1, 1], [], []>} : vector<8x16xf32>, vector<16x128xf32>, vector<8x128xf32> -> vector<8x128xf32>
    %9 = arith.addf %3, %8 : vector<8x128xf32>
    %c0_8 = arith.constant 0 : index
    %c0_9 = arith.constant 0 : index
    %10 = vector.load %arg6[%c0_8, %c0_9] : memref<8x128xf32, #tpu.memory_space<vmem>>, vector<8x128xf32>
    tpu.vector_store %arg6[%c0_8, %c0_9], %9 {strides = array<i32>} : memref<8x128xf32, #tpu.memory_space<vmem>>, vector<8x128xf32>,
    %c7_i32 = arith.constant 7 : i32
    %11 = arith.cmpi eq, %arg1, %c7_i32 : i32
    %12 = arith.extui %11 : i1 to i32
    %c0_i32_10 = arith.constant 0 : i32
    %13 = arith.cmpi ne, %12, %c0_i32_10 : i32
    scf.if %13 {
      %c0_11 = arith.constant 0 : index
      %c0_12 = arith.constant 0 : index
      %14 = vector.load %arg6[%c0_11, %c0_12] : memref<8x128xf32, #tpu.memory_space<vmem>>, vector<8x128xf32>
      %c0_13 = arith.constant 0 : index
      %c0_14 = arith.constant 0 : index
      %15 = vector.load %arg5[%c0_13, %c0_14] : memref<8x128xf32, #tpu.memory_space<vmem>>, vector<8x128xf32>
      tpu.vector_store %arg5[%c0_13, %c0_14], %14 {strides = array<i32>} : memref<8x128xf32, #tpu.memory_space<vmem>>, vector<8x128xf32>,
    } else {
    }
    return
  }
  func.func @transform_0(%arg0: i32, %arg1: i32) -> (i32, i32, i32) {
    %c0_i32 = arith.constant 0 : i32
    %c0_i32_0 = arith.constant 0 : i32
    return %arg1, %arg0, %c0_i32 : i32, i32, i32
  }
  func.func @transform_1(%arg0: i32, %arg1: i32) -> (i32, i32, i32) {
    %c0_i32 = arith.constant 0 : i32
    %c0_i32_0 = arith.constant 0 : i32
    %c0_i32_1 = arith.constant 0 : i32
    return %arg1, %c0_i32, %c0_i32_0 : i32, i32, i32
  }
  func.func @transform_2(%arg0: i32, %arg1: i32) -> (i32, i32) {
    %c0_i32 = arith.constant 0 : i32
    %c0_i32_0 = arith.constant 0 : i32
    %c0_i32_1 = arith.constant 0 : i32
    return %c0_i32, %c0_i32_0 : i32, i32
  }
  func.func @transform_3(%arg0: i32, %arg1: i32) -> (i32, i32) {
    %c0_i32 = arith.constant 0 : i32
    %c0_i32_0 = arith.constant 0 : i32
    return %arg0, %c0_i32 : i32, i32
  }
}

</mosaic_0001>

<bundles_post_ra>
// kernel: tpu_custom_call.1
= control target key start
LH: loop header
LB: loop body
LE: loop exit
PB: predicated region body
PF: predicated region fallthrough
CT: control target
= control target key end

     0   :  { %8 = vsyncpa [#allocation4], 0  ;;  %s909_s0 = inlined_call_operand.hbm [shape: f32[8,8,16], index: 0, kind: input, shape index: {}]   ;;  %s910_s1 = inlined_call_operand.hbm [shape: f32[8,16,128], index: 1, kind: input, shape index: {}]   ;;  %s911_s2 = inlined_call_operand.vmem [shape: f32[1,128], index: 2, kind: input, shape index: {}]   ;;  %s912_s3 = inlined_call_operand.hbm [shape: f32[8,128], index: 3, kind: output, shape index: {}]  }
   0x1   :  { %10 = vsyncpa [#allocation4 + $0x1], 0 }
   0x2   :  { %11 = vsyncpa [#allocation7], 0 }
   0x3   :  { %13 = vsyncpa [#allocation7 + $0x1], 0 }
   0x4   :  { %14 = vsyncpa [#allocation5], 0  ;;  %s705_s12 = smov 0   ;;  %s707_s13 = smov 0  }
   0x5   :  { %s709_s14 = smov 0   ;;  %s711_s15 = smov 0  }
   0x6   :  { %s713_s16 = smov 0   ;;  %s715_s17 = smov 0  }
   0x7 LB: > { %s426_s18 = sadd.s32 4294967295, %s675_s17   ;;  %s29_s19 = sadd.s32 1, %s671_s16  ;;  %s675_s17 = sphi %s715_s17, %s20_s17   ;;  %s671_s16 = sphi %s713_s16, %s926_s16   ;;  %s667_s15 = sphi %s711_s15, %s925_s15   ;;  %s663_s14 = sphi %s709_s14, %s924_s14   ;;  %s659_s13 = sphi %s707_s13, %s923_s13   ;;  %s655_s12 = sphi %s705_s12, %s922_s12  }
   0x8   : > { %p30_p0 = scmp.ge.s32.totalorder %s29_s19, 8  ;;  %s41_s20 = sadd.s32 1, %s663_s14 }
   0x9   : > { %p48_p1 = scmp.ne.s32.totalorder %s663_s14, %s659_s13  ;;  %p49_p2 = scmp.eq.s32.totalorder %s675_s17, 0 }
   0xa   : > { %s928_s19 = smov (%p30_p0, %s29_s19), 0  ;;  %p54_p4 = scmp.ne.s32.totalorder %s659_s13, %s655_s12 }
   0xb   : > { %p741_p3 = por %p49_p2, %p48_p1  ;;  %s36_s22 = ssub.s32 %s671_s16, %s928_s19 }
   0xc   : > { %p55_p5 = scmp.eq.s32.totalorder %s426_s18, 0  ;;  %p39_p6 = scmp.eq.s32.totalorder %s36_s22, 0 }
   0xd   : > { %p474_p8 = scmp.lt.s32.totalorder %s675_s17, 8  ;;  %s759_s25 = sand.u32 1, %s663_s14  }
   0xe   : > { %p750_p7 = por %p55_p5, %p54_p4  ;;  %s430_s26 = sshll.u32 %s671_s16, 7 }
   0xf   : > { %s756_s24 = scalar_select %p39_p6, %s663_s14, %s41_s20  }
  0x10   : > { %s915_s23 = scalar_select %p750_p7, 1, 0 }
  0x11   : > { %s429_s27 = sshll.u32 %s759_s25, 3  ;;  %s766_s30 = scalar_lea.hbm %s909_s0, %s430_s26 }
  0x12   : > { %s158_s4 = scalar_lea.vmem [#allocation3], %s429_s27  ;;  %p770_p9 = pnand %p474_p8, %p741_p3 }
  0x13   : > { %s166_s5 = sshll.u32 %s158_s4, 4  ;;  %s155_s7 = scalar_lea.sflag [#allocation4], %s759_s25  ;;  %s774_s5 = int_to_ptr.vmem [resolvable:$true] %s166_s5 }
  0x14   : > { %s531_s8 = scalar_lea.hbm %s766_s30, 128  ;;  %p533_p13 = pneg %p770_p9 }
  0x15   : > { %p532_p12 = scmp.ne.s32.totalorder %s766_s30, %s531_s8  ;;  %s536_s11 = scalar_lea.hbm %s909_s0, 1024 }
  0x16   : > { %p537_p2 = scmp.lt.u32.totalorder %s766_s30, %s909_s0  ;;  %p538_p3 = scmp.lt.u32.totalorder %s536_s11, %s531_s8 }
  0x17   : > { %p534_p0 = pnand %p533_p13, %p532_p12  ;;  %p540_p5 = scmp.lt.u32.totalorder %s531_s8, %s766_s30 }
  0x18   : > { %p539_p4 = por %p538_p3, %p537_p2 }
  0x19   : > { %p535_p1 = pneg %p534_p0 }
  0x1a   : > { %p541_p6 = por %p540_p5, %p539_p4 }
  0x1c   : > { %p542_p8 = pnand %p541_p6, %p535_p1 }
  0x1e   : > { %545 = shalt.err (!%p542_p8)
}
  0x1f   : > { %s546_s21 = scalar_lea.vmem %s774_s5, 128  ;;  %s677_s22 = smov [#allocation3]  }
  0x20   : > { %p547_p12 = scmp.ne.s32.totalorder %s774_s5, %s546_s21  ;;  %s551_s26 = sshll.u32 %s677_s22, 4  ;;  %s552_s26 = int_to_ptr.vmem [resolvable:$false] %s551_s26 }
  0x21   : > { %s553_s27 = scalar_lea.vmem %s552_s26, 256  ;;  %p554_p11 = scmp.lt.s32.totalorder %s774_s5, %s552_s26 }
  0x22   : > { %p549_p0 = pnand %p547_p12, %p533_p13  ;;  %p555_p2 = scmp.lt.s32.totalorder %s553_s27, %s546_s21 }
  0x24   : > { %p550_p10 = pneg %p549_p0  ;;  %p556_p3 = por %p555_p2, %p554_p11 }
  0x26   : > { %p557_p4 = pnand %p556_p3, %p550_p10 }
  0x28   : > { %560 = shalt.err (!%p557_p4)
}
  0x29   : > { %470 = dma.hbm_to_vmem [thread:$0]  (!%p770_p9), %s766_s30, 128, %s774_s5, %s155_s7  }
  0x2a   : > { %p917_p1 = scmp.lt.s32.totalorder %s675_s17, 9  ;;  %p918_p5 = scmp.ge.s32.totalorder %s675_s17, 1 }
  0x2b   : > { %s431_s29 = sshll.u32 %s759_s25, 4  ;;  %s445_s4 = sshll.u32 %s671_s16, 8 }
  0x2c   : > { %p808_p6 = pnand %p918_p5, %p917_p1  ;;  %s817_s10 = scalar_lea.hbm %s910_s1, %s445_s4 }
  0x2d   : > { %s177_s11 = scalar_lea.vmem [#allocation6], %s431_s29  ;;  %s174_s30 = scalar_lea.sflag [#allocation7], %s759_s25 }
  0x2e   : > { %s184_s12 = sshll.u32 %s177_s11, 4  ;;  %s561_s5 = scalar_lea.hbm %s817_s10, 256  ;;  %s819_s12 = int_to_ptr.vmem [resolvable:$true] %s184_s12 }
  0x2f   : > { %p562_p10 = scmp.ne.s32.totalorder %s817_s10, %s561_s5  ;;  %s566_s21 = scalar_lea.hbm %s910_s1, 2048 }
  0x30   : > { %p567_p12 = scmp.lt.u32.totalorder %s817_s10, %s910_s1  ;;  %p568_p0 = scmp.lt.u32.totalorder %s566_s21, %s561_s5 }
  0x31   : > { %p564_p11 = pnand %p562_p10, %p533_p13  ;;  %p570_p3 = scmp.lt.u32.totalorder %s561_s5, %s817_s10 }
  0x32   : > { %p569_p2 = por %p568_p0, %p567_p12 }
  0x33   : > { %p565_p8 = pneg %p564_p11 }
  0x34   : > { %p571_p4 = por %p570_p3, %p569_p2 }
  0x36   : > { %p572_p1 = pnand %p571_p4, %p565_p8 }
  0x38   : > { %575 = shalt.err (!%p572_p1)
}
  0x39   : > { %s576_s27 = scalar_lea.vmem %s819_s12, 256  ;;  %s678_s29 = smov [#allocation6]  }
  0x3a   : > { %p577_p5 = scmp.ne.s32.totalorder %s819_s12, %s576_s27  ;;  %s581_s4 = sshll.u32 %s678_s29, 4  ;;  %s582_s4 = int_to_ptr.vmem [resolvable:$false] %s581_s4 }
  0x3b   : > { %s583_s8 = scalar_lea.vmem %s582_s4, 512  ;;  %p584_p7 = scmp.lt.s32.totalorder %s819_s12, %s582_s4 }
  0x3c   : > { %p579_p10 = pnand %p577_p5, %p533_p13  ;;  %p585_p12 = scmp.lt.s32.totalorder %s583_s8, %s576_s27 }
  0x3e   : > { %p580_p11 = pneg %p579_p10  ;;  %p586_p0 = por %p585_p12, %p584_p7 }
  0x40   : > { %p587_p2 = pnand %p586_p0, %p580_p11 }
  0x42   : > { %590 = shalt.err (!%p587_p2)
}
  0x43   : > { %s679_s9 = smov 128   ;;  %s680_s11 = smov 8  }
  0x44   : > { %473 = dma.hbm_to_vmem [thread:$0]  (!%p770_p9), %s817_s10, 256, %s819_s12, %s174_s30, %s679_s9, %s679_s9, %s680_s11  }
  0x45   : > { %196 = sbr.rel (%p808_p6) target bundleno = 343 (0x157), region = 32  ;;  %s198_s5 = sand.u32 (!%p808_p6), 1, %s659_s13  }
  0x46   : > { %s435_s7 = sshll.u32 (!%p808_p6), %s198_s5, 3  ;;  %s199_s20 = scalar_lea.sflag (!%p808_p6), [#allocation4], %s198_s5 }
  0x47   : > { %s202_s21 = scalar_lea.vmem (!%p808_p6), [#allocation3], %s435_s7  ;;  %p920_p7 = scmp.ne.s32.totalorder (!%p808_p6), %s915_s23, 0 }
  0x4c   : > { %642 = dma.done.wait (%p920_p7), %s199_s20, 128  }
  0x4d   : > { %644 = vsyncadd (%p920_p7), %s199_s20, 4294967168  ;;  %s436_s22 = sshll.u32 %s198_s5, 4  ;;  %s208_s26 = scalar_lea.sflag [#allocation7], %s198_s5 }
  0x4e   : > { %s211_s6 = scalar_lea.vmem [#allocation6], %s436_s22 }
  0x4f   : > { %646 = dma.done.wait (%p920_p7), %s208_s26, 256  }
  0x50   : > { %648 = vsyncadd (%p920_p7), %s208_s26, 4294967040  ;;  %p437_p9 = scmp.ne.s32.totalorder %s667_s15, 0 }
  0x51   : > { %v438_v0 = vld [vmem:[%s911_s2] ss:$0 sm:$0xff] (!%p437_p9) }
  0x52   : > { %237 = sbr.rel (%p437_p9) target bundleno = 89 (0x59), region = 44  ;;  %245 = vst [vmem:[#allocation2] sm:$0xff] (!%p437_p9), %v438_v0 }
  0x59 PF: > { %v248_v1 = vld [vmem:[%s211_s6] sm:$0xff]  ;;  %v249_v2 = vld [vmem:[%s211_s6 + $0x8] sm:$0xff]  ;;  %v681_v3 = vmov 0.0|0.0   ;;  %vm682_vm0 = vmmov 0   ;;  %v683_v5 = vmov 0.0   ;;  %vm250_vm1 = vcmask 130048  }
  0x5a   : > { %456 = vmatprep.subr.bf16.mxu0 %v681_v3  ;;  %v457_v4 = vpack.c.bf16 %v249_v2, %v248_v1  ;;  %453 = vmatprep.mubr.msk.f32.mxu0 %vm682_vm0, %v683_v5  ;;  %v247_v6 = vld [vmem:[%s202_s21] sm:$0xff]  ;;  %v246_v7 = vld [vmem:[#allocation2] sm:$0xff]  ;;  %p440_p13 = scmp.ne.s32.totalorder %s667_s15, 7 }
  0x5c   : > { %458 = vmatpush3.bf16.msra.mxu0 %v457_v4 }
  0x5f   : > { %454 = vmatmul.mubr.msk.f32.vlgmr.msra.gmra.mrb[0].mxu0 %vm250_vm1, %v247_v6 }
 0x12f   : > { %329 = sbr.rel (%p440_p13) target bundleno = 318 (0x13e), region = 48 }
 0x132   : > { %v320_v8 = vpop.f32.mrb[0].mxu0 }
 0x133   : > { %v324_v9 = vadd.f32 %v320_v8, %v246_v7  ;;  %v455_v10 = vpop.f32.mrb[1].mxu0 }
 0x135   : > { %325 = vst [vmem:[#allocation2] sm:$0xff] %v324_v9 }
 0x13c   : > { %v330_v11 = vld [vmem:[#allocation2] sm:$0xff] }
 0x13d   : > { %331 = vst [vmem:[#allocation8] sm:$0xff] %v330_v11 }
 0x13e PF: > { %p865_p6 = scmp.eq.s32.totalorder %s426_s18, 7  ;;  %s684_s10 = smov [#allocation8]  }
 0x13f   : > { %s341_s12 = sshll.u32 %s684_s10, 4  ;;  %s342_s12 = int_to_ptr.vmem [resolvable:$true] %s341_s12 }
 0x140   : > { %s591_s30 = scalar_lea.vmem %s342_s12, 128  ;;  %p598_p1 = scmp.lt.s32.totalorder %s342_s12, %s342_s12 }
 0x141   : > { %p592_p8 = scmp.ne.s32.totalorder %s342_s12, %s591_s30  ;;  %p599_p5 = scmp.lt.s32.totalorder %s591_s30, %s591_s30 }
 0x143   : > { %p593_p3 = pnand %p592_p8, %p865_p6  ;;  %p600_p10 = por %p599_p5, %p598_p1 }
 0x145   : > { %p594_p4 = pneg %p593_p3 }
 0x147   : > { %p601_p11 = pnand %p600_p10, %p594_p4 }
 0x149   : > { %604 = shalt.err (!%p601_p11)
}
 0x14a   : > { %s605_s18 = scalar_lea.hbm %s912_s3, 128 }
 0x14b   : > { %p606_p12 = scmp.ne.s32.totalorder %s912_s3, %s605_s18  ;;  %p611_p7 = scmp.lt.u32.totalorder %s605_s18, %s912_s3 }
 0x14d   : > { %p607_p0 = pnand %p606_p12, %p865_p6 }
 0x14f   : > { %p608_p2 = pneg %p607_p0 }
 0x151   : > { %p613_p9 = pnand %p611_p7, %p608_p2 }
 0x153   : > { %616 = shalt.err (!%p613_p9)
}
 0x154   : > { %464 = dma.vmem_to_hbm [thread:$0]  (%p865_p6), %s342_s12, 128, %s912_s3, [#allocation5]  }
 0x155   : > { %650 = dma.done.wait (%p865_p6), [#allocation5], 128  }
 0x156   : > { %652 = vsyncadd (%p865_p6), [#allocation5], 4294967168 }
 0x157 PF: > { %s20_s17 = sadd.s32 1, %s675_s17   ;;  %s922_s12 = smov %s659_s13 }
 0x158   : > { %p17_p13 = scmp.ge.s32.totalorder %s20_s17, 10   ;;  %s923_s13 = smov %s663_s14 }
 0x159   : > { %s924_s14 = smov %s756_s24  ;;  %s925_s15 = smov %s671_s16 }
 0x15a   : > { %s926_s16 = smov %s928_s19  ;;  %19 = sbr.rel (!%p17_p13) target bundleno = 7 (0x7), region = 91 }
 0x161   :  { %354 = vsyncpa [#allocation4], 1 }
 0x162   :  { %356 = vsyncpa [#allocation4 + $0x1], 1 }
 0x163   :  { %357 = vsyncpa [#allocation7], 1 }
 0x164   :  { %359 = vsyncpa [#allocation7 + $0x1], 1 }
 0x165   :  { %360 = vsyncpa [#allocation5], 1 }
 0x166   :  { %362 = vsyncpa [#allocation5 + $0x1], 1 }

</bundles_post_ra>
